<compile_context>
chip_gen: v6e
topology: v6e:2x2x1
jax: 0.10.0
libtpu: 0.0.40
codegen_flags: <defaults>
</compile_context>

<pallas_src>
import functools

import jax
import jax.numpy as jnp
from jax.experimental import pallas as pl
from jax.experimental.pallas import tpu as pltpu


def _round_up(x: int, m: int) -> int:
    return ((x + m - 1) // m) * m


def _pad2d(a, rows: int, cols: int):
    r, c = a.shape
    return jnp.pad(a, ((0, rows - r), (0, cols - c)))


# -----------------------------------------------------------------------------
# Kernel: one batch tile of the fused fc1 -> relu -> fc2 -> relu -> fc3 chain.
# -----------------------------------------------------------------------------
def dqn_kernel(x_ref, w1_ref, b1_ref, w2_ref, b2_ref, w3_ref, b3_ref, out_ref):
    # Cast activations to the weight dtype so each dot is a single-pass
    # (bf16 x bf16 -> f32) MXU matmul; accumulation stays f32.
    x = x_ref[...].astype(w1_ref.dtype)
    h1 = jnp.dot(x, w1_ref[...], preferred_element_type=jnp.float32) + b1_ref[...]
    h1 = jnp.maximum(h1, 0.0)
    h2 = jnp.dot(h1.astype(w2_ref.dtype), w2_ref[...],
                 preferred_element_type=jnp.float32) + b2_ref[...]
    h2 = jnp.maximum(h2, 0.0)
    # fc3 runs at the 128-padded width for the MXU; slice down to n_actions
    # in-register so the HBM writeback is only the narrow (tb, n_actions) tile.
    q = jnp.dot(h2.astype(w3_ref.dtype), w3_ref[...],
                preferred_element_type=jnp.float32)
    n_act = out_ref.shape[-1]
    out_ref[...] = (q[:, :n_act] + b3_ref[...]).astype(out_ref.dtype)


# -----------------------------------------------------------------------------
# One-time parameter preparation (call after init / after each optimizer step).
# -----------------------------------------------------------------------------
def prepare_dqn_params(w1, b1, w2, b2, w3, b3, *, weight_dtype=jnp.bfloat16):
    """Pad hidden/action dims to 128 lanes and cast weights ONCE so the
    per-forward path contains no pad/convert XLA ops.

    Weights are expected as (in_dim, out_dim); pass `weight.T` when importing
    PyTorch nn.Linear parameters. Biases may be (out,) or (1, out).
    """
    as_row = lambda b: jnp.asarray(b, jnp.float32).reshape(1, -1)
    w1 = jnp.asarray(w1, jnp.float32)
    w2 = jnp.asarray(w2, jnp.float32)
    w3 = jnp.asarray(w3, jnp.float32)

    d_in, h1 = w1.shape
    h2 = w2.shape[1]
    n_act = w3.shape[1]
    h1_p = _round_up(h1, 128)
    h2_p = _round_up(h2, 128)
    n_p = _round_up(n_act, 128)

    w1_p = _pad2d(w1, d_in, h1_p).astype(weight_dtype)   # input dim left unpadded
    w2_p = _pad2d(w2, h1_p, h2_p).astype(weight_dtype)
    w3_p = _pad2d(w3, h2_p, n_p).astype(weight_dtype)
    b1_p = _pad2d(as_row(b1), 1, h1_p)                    # biases stay f32
    b2_p = _pad2d(as_row(b2), 1, h2_p)
    b3_r = as_row(b3)                                     # unpadded: width == n_actions
    return w1_p, b1_p, w2_p, b2_p, w3_p, b3_r


# -----------------------------------------------------------------------------
# Forward pass.
# -----------------------------------------------------------------------------
@functools.partial(jax.jit, static_argnames=("tile_b",))
def dqn_forward(state, w1_p, b1_p, w2_p, b2_p, w3_p, b3_r, *, tile_b: int = 512):
    """Fused DQN forward on pre-padded / pre-cast params (prepare_dqn_params)."""
    B, d_in = state.shape
    h1_p = w1_p.shape[1]
    h2_p = w2_p.shape[1]
    n_p = w3_p.shape[1]
    n_act = b3_r.shape[1]

    # ---- batch tiling: minimal tail padding, >=2 tiles to feed v7x's 2 TCs ----
    n_tiles = pl.cdiv(B, tile_b)
    if B >= 16:
        n_tiles = max(n_tiles, 2)
    tb = _round_up(pl.cdiv(B, n_tiles), 8)
    B_p = _round_up(B, tb)
    grid = (B_p // tb,)

    x = state
    if B_p != B:                       # only pad the batch when there is a tail
        x = jnp.pad(x, ((0, B_p - B), (0, 0)))

    const = lambda i: (0, 0)
    in_specs = [
        pl.BlockSpec((tb, d_in), lambda i: (i, 0)),   # state tile (K unpadded)
        pl.BlockSpec((d_in, h1_p), const),            # w1 (VMEM-resident)
        pl.BlockSpec((1, h1_p), const),               # b1
        pl.BlockSpec((h1_p, h2_p), const),            # w2
        pl.BlockSpec((1, h2_p), const),               # b2
        pl.BlockSpec((h2_p, n_p), const),             # w3 (128-padded N for MXU)
        pl.BlockSpec((1, n_act), const),              # b3 (unpadded)
    ]
    out_spec = pl.BlockSpec((tb, n_act), lambda i: (i, 0))

    nbytes = lambda a: a.size * a.dtype.itemsize
    cost = pl.CostEstimate(
        flops=2 * B_p * (d_in * h1_p + h1_p * h2_p + h2_p * n_p),
        transcendentals=0,
        bytes_accessed=(nbytes(x) + nbytes(w1_p) + nbytes(b1_p) + nbytes(w2_p)
                        + nbytes(b2_p) + nbytes(w3_p) + nbytes(b3_r)
                        + B_p * n_act * 4),
    )

    out = pl.pallas_call(
        dqn_kernel,
        out_shape=jax.ShapeDtypeStruct((B_p, n_act), jnp.float32),
        grid=grid,
        in_specs=in_specs,
        out_specs=out_spec,
        compiler_params=pltpu.CompilerParams(
            dimension_semantics=("parallel",),   # megacore: split batch tiles
        ),
        cost_estimate=cost,
    )(x, w1_p, b1_p, w2_p, b2_p, w3_p, b3_r)

    return out[:B] if B_p != B else out


def init_linear(key, in_dim, out_dim):
    """PyTorch-style uniform(+/- 1/sqrt(fan_in)) init; weight stored as (in, out)."""
    kw, kb = jax.random.split(key)
    bound = 1.0 / jnp.sqrt(jnp.float32(in_dim))
    w = jax.random.uniform(kw, (in_dim, out_dim), jnp.float32, -bound, bound)
    b = jax.random.uniform(kb, (out_dim,), jnp.float32, -bound, bound)
    return w, b


if __name__ == "__main__":
    # DQN(input_dims=(32,), fc1_dims=64, fc2_dims=64, n_actions=8, lr=...)
    input_dim, fc1_dims, fc2_dims, n_actions, batch = 32, 64, 64, 8, 8

    key = jax.random.PRNGKey(0)
    k_state, k1, k2, k3 = jax.random.split(key, 4)

    state = jax.random.normal(k_state, (batch, input_dim), jnp.float32)
    w1, b1 = init_linear(k1, input_dim, fc1_dims)
    w2, b2 = init_linear(k2, fc1_dims, fc2_dims)
    w3, b3 = init_linear(k3, fc2_dims, n_actions)

    # Pure-JAX reference of the forward semantics (f32).
    ref = jnp.maximum(state @ w1 + b1, 0.0)
    ref = jnp.maximum(ref @ w2 + b2, 0.0)
    ref = ref @ w3 + b3

    # --- f32 weights: tight correctness check --------------------------------
    params_f32 = prepare_dqn_params(w1, b1, w2, b2, w3, b3,
                                    weight_dtype=jnp.float32)
    out_f32 = jax.block_until_ready(dqn_forward(state, *params_f32))
    assert out_f32.shape == (batch, n_actions)
    assert jnp.allclose(out_f32, ref, atol=1e-5, rtol=1e-5)

    # --- bf16 weights (default, MXU-native): loose check against f32 ref -----
    params_bf16 = prepare_dqn_params(w1, b1, w2, b2, w3, b3)
    out_bf16 = jax.block_until_ready(dqn_forward(state, *params_bf16))
    assert out_bf16.shape == (batch, n_actions)
    assert jnp.allclose(out_bf16, ref, atol=3e-2, rtol=3e-2)

    print("KERNEL_OK")
</pallas_src>

<mosaic_0001>
module attributes {stable_mosaic.version = 11 : i64} {
  func.func @dqn_kernel(%arg0: i32, %arg1: memref<8x32xf32, #tpu.memory_space<vmem>>, %arg2: memref<32x128xf32, #tpu.memory_space<vmem>>, %arg3: memref<1x128xf32, #tpu.memory_space<vmem>>, %arg4: memref<128x128xf32, #tpu.memory_space<vmem>>, %arg5: memref<1x128xf32, #tpu.memory_space<vmem>>, %arg6: memref<128x128xf32, #tpu.memory_space<vmem>>, %arg7: memref<1x8xf32, #tpu.memory_space<vmem>>, %arg8: memref<8x8xf32, #tpu.memory_space<vmem>>) attributes {dimension_semantics = [#tpu.dimension_semantics<parallel>], iteration_bounds = array<i64: 1>, scalar_prefetch = 0 : i64, scratch_operands = 0 : i64, tpu.core_type = #tpu.core_type<tc>, window_params = [{transform_indices = @transform_0, window_bounds = array<i64: 8, 32>}, {pipeline_mode = #tpu.pipeline_mode<synchronous>, transform_indices = @transform_1, window_bounds = array<i64: 32, 128>}, {pipeline_mode = #tpu.pipeline_mode<synchronous>, transform_indices = @transform_2, window_bounds = array<i64: 1, 128>}, {pipeline_mode = #tpu.pipeline_mode<synchronous>, transform_indices = @transform_3, window_bounds = array<i64: 128, 128>}, {pipeline_mode = #tpu.pipeline_mode<synchronous>, transform_indices = @transform_4, window_bounds = array<i64: 1, 128>}, {pipeline_mode = #tpu.pipeline_mode<synchronous>, transform_indices = @transform_5, window_bounds = array<i64: 128, 128>}, {pipeline_mode = #tpu.pipeline_mode<synchronous>, transform_indices = @transform_6, window_bounds = array<i64: 1, 8>}, {transform_indices = @transform_7, window_bounds = array<i64: 8, 8>}]} {
    %c0 = arith.constant 0 : index
    %c0_0 = arith.constant 0 : index
    %0 = vector.load %arg1[%c0, %c0_0] : memref<8x32xf32, #tpu.memory_space<vmem>>, vector<8x32xf32>
    %c0_1 = arith.constant 0 : index
    %c0_2 = arith.constant 0 : index
    %1 = vector.load %arg2[%c0_1, %c0_2] : memref<32x128xf32, #tpu.memory_space<vmem>>, vector<32x128xf32>
    %cst = arith.constant dense<0.000000e+00> : vector<8x128xf32>
    %2 = tpu.matmul %0, %1, %cst {dimension_numbers = #tpu.dot_dimension_numbers<[1], [0], [0], [1], [0, 0, 1, 1], [], []>} : vector<8x32xf32>, vector<32x128xf32>, vector<8x128xf32> -> vector<8x128xf32>
    %c0_3 = arith.constant 0 : index
    %c0_4 = arith.constant 0 : index
    %3 = vector.load %arg3[%c0_3, %c0_4] : memref<1x128xf32, #tpu.memory_space<vmem>>, vector<1x128xf32>
    %4 = vector.broadcast %3 : vector<1x128xf32> to vector<8x128xf32>
    %5 = arith.addf %2, %4 : vector<8x128xf32>
    %cst_5 = arith.constant 0.000000e+00 : f32
    %6 = vector.broadcast %cst_5 : f32 to vector<8x128xf32>
    %7 = arith.maximumf %5, %6 : vector<8x128xf32>
    %c0_6 = arith.constant 0 : index
    %c0_7 = arith.constant 0 : index
    %8 = vector.load %arg4[%c0_6, %c0_7] : memref<128x128xf32, #tpu.memory_space<vmem>>, vector<128x128xf32>
    %cst_8 = arith.constant dense<0.000000e+00> : vector<8x128xf32>
    %9 = tpu.matmul %7, %8, %cst_8 {dimension_numbers = #tpu.dot_dimension_numbers<[1], [0], [0], [1], [0, 0, 1, 1], [], []>} : vector<8x128xf32>, vector<128x128xf32>, vector<8x128xf32> -> vector<8x128xf32>
    %c0_9 = arith.constant 0 : index
    %c0_10 = arith.constant 0 : index
    %10 = vector.load %arg5[%c0_9, %c0_10] : memref<1x128xf32, #tpu.memory_space<vmem>>, vector<1x128xf32>
    %11 = vector.broadcast %10 : vector<1x128xf32> to vector<8x128xf32>
    %12 = arith.addf %9, %11 : vector<8x128xf32>
    %cst_11 = arith.constant 0.000000e+00 : f32
    %13 = vector.broadcast %cst_11 : f32 to vector<8x128xf32>
    %14 = arith.maximumf %12, %13 : vector<8x128xf32>
    %c0_12 = arith.constant 0 : index
    %c0_13 = arith.constant 0 : index
    %15 = vector.load %arg6[%c0_12, %c0_13] : memref<128x128xf32, #tpu.memory_space<vmem>>, vector<128x128xf32>
    %cst_14 = arith.constant dense<0.000000e+00> : vector<8x128xf32>
    %16 = tpu.matmul %14, %15, %cst_14 {dimension_numbers = #tpu.dot_dimension_numbers<[1], [0], [0], [1], [0, 0, 1, 1], [], []>} : vector<8x128xf32>, vector<128x128xf32>, vector<8x128xf32> -> vector<8x128xf32>
    %17 = vector.extract_strided_slice %16 {offsets = [0, 0], sizes = [8, 8], strides = [1, 1]} : vector<8x128xf32> to vector<8x8xf32>
    %c0_15 = arith.constant 0 : index
    %c0_16 = arith.constant 0 : index
    %18 = vector.load %arg7[%c0_15, %c0_16] : memref<1x8xf32, #tpu.memory_space<vmem>>, vector<1x8xf32>
    %19 = vector.broadcast %18 : vector<1x8xf32> to vector<8x8xf32>
    %20 = arith.addf %17, %19 : vector<8x8xf32>
    %c0_17 = arith.constant 0 : index
    %c0_18 = arith.constant 0 : index
    %21 = vector.load %arg8[%c0_17, %c0_18] : memref<8x8xf32, #tpu.memory_space<vmem>>, vector<8x8xf32>
    tpu.vector_store %arg8[%c0_17, %c0_18], %20 {strides = array<i32>} : memref<8x8xf32, #tpu.memory_space<vmem>>, vector<8x8xf32>,
    return
  }
  func.func @transform_0(%arg0: i32) -> (i32, i32) {
    %c0_i32 = arith.constant 0 : i32
    %c0_i32_0 = arith.constant 0 : i32
    return %arg0, %c0_i32 : i32, i32
  }
  func.func @transform_1(%arg0: i32) -> (i32, i32) {
    %c0_i32 = arith.constant 0 : i32
    %c0_i32_0 = arith.constant 0 : i32
    %c0_i32_1 = arith.constant 0 : i32
    return %c0_i32, %c0_i32_0 : i32, i32
  }
  func.func @transform_2(%arg0: i32) -> (i32, i32) {
    %c0_i32 = arith.constant 0 : i32
    %c0_i32_0 = arith.constant 0 : i32
    %c0_i32_1 = arith.constant 0 : i32
    return %c0_i32, %c0_i32_0 : i32, i32
  }
  func.func @transform_3(%arg0: i32) -> (i32, i32) {
    %c0_i32 = arith.constant 0 : i32
    %c0_i32_0 = arith.constant 0 : i32
    %c0_i32_1 = arith.constant 0 : i32
    return %c0_i32, %c0_i32_0 : i32, i32
  }
  func.func @transform_4(%arg0: i32) -> (i32, i32) {
    %c0_i32 = arith.constant 0 : i32
    %c0_i32_0 = arith.constant 0 : i32
    %c0_i32_1 = arith.constant 0 : i32
    return %c0_i32, %c0_i32_0 : i32, i32
  }
  func.func @transform_5(%arg0: i32) -> (i32, i32) {
    %c0_i32 = arith.constant 0 : i32
    %c0_i32_0 = arith.constant 0 : i32
    %c0_i32_1 = arith.constant 0 : i32
    return %c0_i32, %c0_i32_0 : i32, i32
  }
  func.func @transform_6(%arg0: i32) -> (i32, i32) {
    %c0_i32 = arith.constant 0 : i32
    %c0_i32_0 = arith.constant 0 : i32
    %c0_i32_1 = arith.constant 0 : i32
    return %c0_i32, %c0_i32_0 : i32, i32
  }
  func.func @transform_7(%arg0: i32) -> (i32, i32) {
    %c0_i32 = arith.constant 0 : i32
    %c0_i32_0 = arith.constant 0 : i32
    return %arg0, %c0_i32 : i32, i32
  }
}

</mosaic_0001>

<bundles_post_ra>
// kernel: dqn_forward.1
= control target key start
LH: loop header
LB: loop body
LE: loop exit
PB: predicated region body
PF: predicated region fallthrough
CT: control target
= control target key end

     0   :  { %12 = vsyncpa [#allocation3], 0  ;;  %s739_s0 = inlined_call_operand.hbm [shape: f32[8,32], index: 0, kind: input, shape index: {}]   ;;  %s740_s1 = inlined_call_operand.hbm [shape: f32[32,128], index: 1, kind: input, shape index: {}]   ;;  %s741_s2 = inlined_call_operand.vmem [shape: f32[1,128], index: 2, kind: input, shape index: {}]   ;;  %s742_s3 = inlined_call_operand.hbm [shape: f32[128,128], index: 3, kind: input, shape index: {}]   ;;  %s743_s4 = inlined_call_operand.vmem [shape: f32[1,128], index: 4, kind: input, shape index: {}]   ;;  %s744_s5 = inlined_call_operand.hbm [shape: f32[128,128], index: 5, kind: input, shape index: {}]   ;;  %s745_s6 = inlined_call_operand.vmem [shape: f32[1,8], index: 6, kind: input, shape index: {}]   ;;  %s746_s7 = inlined_call_operand.hbm [shape: f32[8,8], index: 7, kind: output, shape index: {}]  }
   0x1   :  { %13 = vsyncpa [#allocation6], 0 }
   0x2   :  { %14 = vsyncpa [#allocation9], 0 }
   0x3   :  { %15 = vsyncpa [#allocation4], 0  ;;  %s615_s24 = smov [#allocation5]  }
   0x4   :  { %s31_s25 = sshll.u32 %s615_s24, 4  ;;  %s32_s25 = int_to_ptr.vmem [resolvable:$true] %s31_s25 }
   0x5   :  { %s515_s26 = scalar_lea.vmem %s32_s25, 512  ;;  %p520_p1 = scmp.lt.s32.totalorder %s32_s25, %s32_s25 }
   0x6   :  { %p516_p0 = scmp.ne.s32.totalorder %s32_s25, %s515_s26  ;;  %p521_p2 = scmp.lt.s32.totalorder %s515_s26, %s515_s26 }
   0x8   :  { %p522_p3 = por %p521_p2, %p520_p1 }
   0xa   :  { %p523_p4 = pnand %p522_p3, %p516_p0 }
   0xc   :  { %526 = shalt.err (!%p523_p4)
}
   0xd   :  { %s616_s27 = smov 128   ;;  %s617_s28 = smov 8  }
   0xe   :  { %37 = dma.hbm_to_vmem [thread:$0]  %s740_s1, 512, %s32_s25, [#allocation6], %s616_s27, %s616_s27, %s617_s28  }
   0xf   :  { %s618_s8 = smov [#allocation2]   ;;  %s619_s10 = smov [#allocation7]  }
  0x10   :  { %s22_s9 = sshll.u32 %s618_s8, 4  ;;  %s45_s11 = sshll.u32 %s619_s10, 4  ;;  %s23_s9 = int_to_ptr.vmem [resolvable:$true] %s22_s9  ;;  %s46_s11 = int_to_ptr.vmem [resolvable:$true] %s45_s11 }
  0x11   :  { %s535_s12 = scalar_lea.vmem %s23_s9, 128  ;;  %p540_p6 = scmp.lt.s32.totalorder %s23_s9, %s23_s9 }
  0x12   :  { %p536_p5 = scmp.ne.s32.totalorder %s23_s9, %s535_s12  ;;  %p541_p7 = scmp.lt.s32.totalorder %s535_s12, %s535_s12 }
  0x14   :  { %p542_p8 = por %p541_p7, %p540_p6 }
  0x16   :  { %p543_p9 = pnand %p542_p8, %p536_p5 }
  0x18   :  { %546 = shalt.err (!%p543_p9)
}
  0x19   :  { %25 = dma.hbm_to_vmem [thread:$0]  %s739_s0, 128, %s23_s9, [#allocation3]  }
  0x1a   :  { %s555_s15 = scalar_lea.vmem %s46_s11, 2048  ;;  %p560_p11 = scmp.lt.s32.totalorder %s46_s11, %s46_s11 }
  0x1b   :  { %p556_p10 = scmp.ne.s32.totalorder %s46_s11, %s555_s15  ;;  %p561_p12 = scmp.lt.s32.totalorder %s555_s15, %s555_s15 }
  0x1d   :  { %p562_p13 = por %p561_p12, %p560_p11 }
  0x1f   :  { %p563_p0 = pnand %p562_p13, %p556_p10 }
  0x21   :  { %566 = shalt.err (!%p563_p0)
}
  0x22   :  { %51 = dma.hbm_to_vmem [thread:$0]  %s742_s3, 2048, %s46_s11, [#allocation6], %s616_s27, %s616_s27, %s617_s28  }
  0x23   :  { %s620_s17 = smov [#allocation8]  }
  0x24   :  { %s59_s18 = sshll.u32 %s620_s17, 4  ;;  %s60_s18 = int_to_ptr.vmem [resolvable:$true] %s59_s18 }
  0x25   :  { %s575_s19 = scalar_lea.vmem %s60_s18, 2048  ;;  %p580_p2 = scmp.lt.s32.totalorder %s60_s18, %s60_s18 }
  0x26   :  { %p576_p1 = scmp.ne.s32.totalorder %s60_s18, %s575_s19  ;;  %p581_p3 = scmp.lt.s32.totalorder %s575_s19, %s575_s19 }
  0x28   :  { %p582_p4 = por %p581_p3, %p580_p2 }
  0x2a   :  { %p583_p5 = pnand %p582_p4, %p576_p1 }
  0x2c   :  { %586 = shalt.err (!%p583_p5)
}
  0x2d   :  { %65 = dma.hbm_to_vmem [thread:$0]  %s744_s5, 2048, %s60_s18, [#allocation9], %s616_s27, %s616_s27, %s617_s28  }
  0x2e   :  { %607 = dma.done.wait [#allocation3], 128  }
  0x2f   :  { %608 = vsyncadd [#allocation3], 4294967168 }
  0x30   :  { %609 = dma.done.wait [#allocation6], 2560  }
  0x31   :  { %610 = vsyncadd [#allocation6], 4294964736 }
  0x32   :  { %611 = dma.done.wait [#allocation9], 2048  }
  0x33   :  { %612 = vsyncadd [#allocation9], 4294965248  ;;  %v621_v0 = vmov 0.0   ;;  %vm622_vm0 = vmmov 0   ;;  %v84_v1 = vld [vmem:[#allocation5 + $0x18] sm:$0xff]  ;;  %v83_v2 = vld [vmem:[#allocation5 + $0x10] sm:$0xff] }
  0x34   :  { %417 = vmatprep.subr.mxu0 %v621_v0  ;;  %425 = vmatprep.mubr.msk.f32.mxu0 %vm622_vm0, %v621_v0  ;;  %v182_v3 = vld [vmem:[#allocation7 + $0x78] sm:$0xff]  ;;  %v82_v4 = vld [vmem:[#allocation5 + $0x8] sm:$0xff]  ;;  %v181_v5 = vld [vmem:[#allocation7 + $0x70] sm:$0xff]  ;;  %vm92_vm1 = vcmask 261120   ;;  %s623_s24 = smov [#allocation10]   ;;  %vm355_vm2 = vcmask 64512  }
  0x35   :  { %428 = vmatprep.subr.mxu1 %v621_v0  ;;  %460 = vmatprep.mubr.msk.f32.mxu1 %vm622_vm0, %v621_v0  ;;  %v180_v6 = vld [vmem:[#allocation7 + $0x68] sm:$0xff]  ;;  %v81_v7 = vld [vmem:[#allocation5] sm:$0xff]  ;;  %v80_v8 = vld [vmem:[#allocation2] sm:$0xff]  ;;  %s363_s25 = sshll.u32 %s623_s24, 4  ;;  %s364_s25 = int_to_ptr.vmem [resolvable:$true] %s363_s25 }
  0x36   :  { %418 = vmatpush3.msra.mxu0 %v84_v1  ;;  %429 = vmatpush3.msra.mxu1 %v182_v3  ;;  %v179_v9 = vld [vmem:[#allocation7 + $0x60] sm:$0xff]  ;;  %v178_v10 = vld [vmem:[#allocation7 + $0x58] sm:$0xff]  ;;  %v177_v11 = vld [vmem:[#allocation7 + $0x50] sm:$0xff]  ;;  %s587_s26 = scalar_lea.vmem %s364_s25, 128  ;;  %p592_p7 = scmp.lt.s32.totalorder %s364_s25, %s364_s25 }
  0x37   :  { %419 = vmatprep.subr.mxu0 %v621_v0  ;;  %430 = vmatprep.subr.mxu1 %v621_v0  ;;  %v176_v12 = vld [vmem:[#allocation7 + $0x48] sm:$0xff]  ;;  %v175_v13 = vld [vmem:[#allocation7 + $0x40] sm:$0xff]  ;;  %v174_v14 = vld [vmem:[#allocation7 + $0x38] sm:$0xff]  ;;  %p588_p6 = scmp.ne.s32.totalorder %s364_s25, %s587_s26  ;;  %p593_p8 = scmp.lt.s32.totalorder %s587_s26, %s587_s26 }
  0x38   :  { %420 = vmatpush3.msra.mxu0 %v83_v2  ;;  %431 = vmatpush3.msra.mxu1 %v181_v5  ;;  %v173_v15 = vld [vmem:[#allocation7 + $0x30] sm:$0xff]  ;;  %v172_v16 = vld [vmem:[#allocation7 + $0x28] sm:$0xff]  ;;  %v171_v17 = vld [vmem:[#allocation7 + $0x20] sm:$0xff] }
  0x39   :  { %421 = vmatprep.subr.mxu0 %v621_v0  ;;  %432 = vmatprep.subr.mxu1 %v621_v0  ;;  %v170_v18 = vld [vmem:[#allocation7 + $0x18] sm:$0xff]  ;;  %v169_v19 = vld [vmem:[#allocation7 + $0x10] sm:$0xff]  ;;  %v168_v20 = vld [vmem:[#allocation7 + $0x8] sm:$0xff]  ;;  %p594_p9 = por %p593_p8, %p592_p7 }
  0x3a   :  { %422 = vmatpush3.msra.mxu0 %v82_v4  ;;  %433 = vmatpush3.msra.mxu1 %v180_v6  ;;  %v167_v21 = vld [vmem:[#allocation7] sm:$0xff]  ;;  %v276_v22 = vld [vmem:[#allocation8 + $0x78] sm:$0xff]  ;;  %v275_v23 = vld [vmem:[#allocation8 + $0x70] sm:$0xff] }
  0x3b   :  { %423 = vmatprep.subr.mxu0 %v621_v0  ;;  %434 = vmatprep.subr.mxu1 %v621_v0  ;;  %v274_v24 = vld [vmem:[#allocation8 + $0x68] sm:$0xff]  ;;  %v273_v25 = vld [vmem:[#allocation8 + $0x60] sm:$0xff]  ;;  %v272_v26 = vld [vmem:[#allocation8 + $0x58] sm:$0xff]  ;;  %p595_p10 = pnand %p594_p9, %p588_p6 }
  0x3c   :  { %424 = vmatpush3.msra.mxu0 %v81_v7  ;;  %435 = vmatpush3.msra.mxu1 %v179_v9  ;;  %v271_v27 = vld [vmem:[#allocation8 + $0x50] sm:$0xff]  ;;  %v270_v28 = vld [vmem:[#allocation8 + $0x48] sm:$0xff]  ;;  %v269_v29 = vld [vmem:[#allocation8 + $0x40] sm:$0xff] }
  0x3d   :  { %426 = vmatmul.mubr.msk.f32.vlgmr.msra.gmra.mxu0 %vm92_vm1, %v80_v8  ;;  %436 = vmatprep.subr.mxu1 %v621_v0  ;;  %v268_v30 = vld [vmem:[#allocation8 + $0x38] sm:$0xff]  ;;  %v267_v31 = vld [vmem:[#allocation8 + $0x30] sm:$0xff]  ;;  %v266_v32 = vld [vmem:[#allocation8 + $0x28] sm:$0xff] }
  0x3e   :  { %463 = vmatprep.subr.mxu0 %v621_v0  ;;  %437 = vmatpush3.msra.mxu1 %v178_v10  ;;  %v265_v33 = vld [vmem:[#allocation8 + $0x20] sm:$0xff]  ;;  %v264_v34 = vld [vmem:[#allocation8 + $0x18] sm:$0xff]  ;;  %v263_v40 = vld [vmem:[#allocation8 + $0x10] sm:$0xff] }
  0x3f   :  { %495 = vmatprep.mubr.msk.f32.mxu0 %vm622_vm0, %v621_v0  ;;  %438 = vmatprep.subr.mxu1 %v621_v0  ;;  %v374_v35 = vld [vmem:[%s741_s2] ss:$0 sm:$0xff]  ;;  %v262_v41 = vld [vmem:[#allocation8 + $0x8] sm:$0xff]  ;;  %v261_v42 = vld [vmem:[#allocation8] sm:$0xff] }
  0x40   :  { %439 = vmatpush3.msra.mxu1 %v177_v11  ;;  %464 = vmatpush3.msra.mxu0 %v276_v22  ;;  %v376_v43 = vld [vmem:[%s743_s4] ss:$0 sm:$0xff] }
  0x41   :  { %440 = vmatprep.subr.mxu1 %v621_v0  ;;  %465 = vmatprep.subr.mxu0 %v621_v0  ;;  %v377_v48 = vld [vmem:[%s745_s6] ss:$0 sm:$0xff] }
  0x42   :  { %441 = vmatpush3.msra.mxu1 %v176_v12  ;;  %466 = vmatpush3.msra.mxu0 %v275_v23 }
  0x43   :  { %442 = vmatprep.subr.mxu1 %v621_v0  ;;  %467 = vmatprep.subr.mxu0 %v621_v0 }
  0x44   :  { %443 = vmatpush3.msra.mxu1 %v175_v13  ;;  %468 = vmatpush3.msra.mxu0 %v274_v24 }
  0x45   :  { %444 = vmatprep.subr.mxu1 %v621_v0  ;;  %469 = vmatprep.subr.mxu0 %v621_v0 }
  0x46   :  { %445 = vmatpush3.msra.mxu1 %v174_v14  ;;  %470 = vmatpush3.msra.mxu0 %v273_v25 }
  0x47   :  { %446 = vmatprep.subr.mxu1 %v621_v0  ;;  %471 = vmatprep.subr.mxu0 %v621_v0 }
  0x48   :  { %447 = vmatpush3.msra.mxu1 %v173_v15  ;;  %472 = vmatpush3.msra.mxu0 %v272_v26 }
  0x49   :  { %448 = vmatprep.subr.mxu1 %v621_v0  ;;  %473 = vmatprep.subr.mxu0 %v621_v0 }
  0x4a   :  { %449 = vmatpush3.msra.mxu1 %v172_v16  ;;  %474 = vmatpush3.msra.mxu0 %v271_v27 }
  0x4b   :  { %450 = vmatprep.subr.mxu1 %v621_v0  ;;  %475 = vmatprep.subr.mxu0 %v621_v0 }
  0x4c   :  { %451 = vmatpush3.msra.mxu1 %v171_v17  ;;  %476 = vmatpush3.msra.mxu0 %v270_v28 }
  0x4d   :  { %452 = vmatprep.subr.mxu1 %v621_v0  ;;  %477 = vmatprep.subr.mxu0 %v621_v0 }
  0x4e   :  { %453 = vmatpush3.msra.mxu1 %v170_v18  ;;  %478 = vmatpush3.msra.mxu0 %v269_v29 }
  0x4f   :  { %454 = vmatprep.subr.mxu1 %v621_v0  ;;  %479 = vmatprep.subr.mxu0 %v621_v0 }
  0x50   :  { %455 = vmatpush3.msra.mxu1 %v169_v19  ;;  %480 = vmatpush3.msra.mxu0 %v268_v30 }
  0x51   :  { %456 = vmatprep.subr.mxu1 %v621_v0  ;;  %481 = vmatprep.subr.mxu0 %v621_v0 }
  0x52   :  { %457 = vmatpush3.msra.mxu1 %v168_v20  ;;  %482 = vmatpush3.msra.mxu0 %v267_v31 }
  0x53   :  { %458 = vmatprep.subr.mxu1 %v621_v0  ;;  %483 = vmatprep.subr.mxu0 %v621_v0 }
  0x54   :  { %459 = vmatpush3.msra.mxu1 %v167_v21  ;;  %484 = vmatpush3.msra.mxu0 %v266_v32 }
  0x55   :  { %485 = vmatprep.subr.mxu0 %v621_v0 }
  0x56   :  { %486 = vmatpush3.msra.mxu0 %v265_v33 }
  0x57   :  { %487 = vmatprep.subr.mxu0 %v621_v0 }
  0x58   :  { %488 = vmatpush3.msra.mxu0 %v264_v34 }
  0x59   :  { %489 = vmatprep.subr.mxu0 %v621_v0 }
  0x5a   :  { %490 = vmatpush3.msra.mxu0 %v263_v40 }
  0x5b   :  { %491 = vmatprep.subr.mxu0 %v621_v0 }
  0x5c   :  { %492 = vmatpush3.msra.mxu0 %v262_v41 }
  0x5d   :  { %493 = vmatprep.subr.mxu0 %v621_v0 }
  0x5e   :  { %494 = vmatpush3.msra.mxu0 %v261_v42 }
  0xfd   :  { %v162_v36 = vpop.f32.mrf.mxu0 }
  0xfe   :  { %v163_v37 = vadd.f32 %v374_v35, %v162_v36 }
  0xff   :  { %v427_v38 = vpop.f32.mrf.mxu0 }
 0x100   :  { %v166_v39 = vmax.f32 %v163_v37, 0.0 }
 0x102   :  { %461 = vmatmul.mubr.f32.vlgmr.msra.gmra.mxu1 %v166_v39 }
 0x1c2   :  { %v256_v44 = vpop.f32.mrf.mxu1 }
 0x1c3   :  { %v257_v45 = vadd.f32 %v376_v43, %v256_v44 }
 0x1c4   :  { %v462_v46 = vpop.f32.mrf.mxu1 }
 0x1c5   :  { %v260_v47 = vmax.f32 %v257_v45, 0.0 }
 0x1c7   :  { %496 = vmatmul.mubr.f32.vlgmr.msra.gmra.mxu0 %v260_v47 }
 0x287   :  { %v343_v49 = vpop.f32.mrf.mxu0 }
 0x288   :  { %v354_v50 = vadd.f32 %v377_v48, %v343_v49 }
 0x289   :  { %v497_v51 = vpop.f32.mrf.mxu0 }
 0x28a   :  { %356 = vst.msk [vmem:[#allocation10] sm:$0xff] %vm355_vm2, %v354_v50 }
 0x28b   :  { %598 = shalt.err (!%p595_p10)
}
 0x28c   :  { %366 = dma.vmem_to_hbm [thread:$0]  %s364_s25, 128, %s746_s7, [#allocation4]  }
 0x28d   :  { %613 = dma.done.wait [#allocation4], 128  }
 0x28e   :  { %614 = vsyncadd [#allocation4], 4294967168 }
 0x28f   :  { %370 = vsyncpa [#allocation3], 1 }
 0x290   :  { %371 = vsyncpa [#allocation6], 1 }
 0x291   :  { %372 = vsyncpa [#allocation9], 1 }
 0x292   :  { %373 = vsyncpa [#allocation4], 1 }

</bundles_post_ra>
